<compile_context>
chip_gen: v7x
topology: tpu7x:2x2x1
jax: 0.10.0
libtpu: 0.0.40
codegen_flags: <defaults>
</compile_context>

<pallas_src>
import functools
import math

import jax
import jax.numpy as jnp
from jax.experimental import pallas as pl
from jax.experimental.pallas import tpu as pltpu


LANE = 128
_BF16 = 2
_F32 = 4


def _round_up(x, m):
    return ((x + m - 1) // m) * m


def _pick_tile(size, preferred):
    """Largest divisor of `size` that is <= preferred and 8-aligned (or == size)."""
    if size <= preferred:
        return size
    for t in range(preferred, 0, -1):
        if size % t == 0 and (t % 8 == 0 or t == size):
            return t
    return size


# ---------------------------------------------------------------------------
# Kernel 1: per-(batch, head) Q/K/V projections (hoisted out of attention).
# ---------------------------------------------------------------------------
def _proj_kernel(q_ref, k_ref, v_ref,
                 wq_ref, bq_ref, wk_ref, bk_ref, wv_ref, bv_ref,
                 qp_ref, kp_ref, vp_ref):
    # single cast to bf16 right after the bias add; nothing else keeps the
    # f32 projections live.
    qp_ref[0, 0] = (jnp.dot(q_ref[0], wq_ref[0],
                            preferred_element_type=jnp.float32)
                    + bq_ref[0]).astype(qp_ref.dtype)
    kp_ref[0, 0] = (jnp.dot(k_ref[0], wk_ref[0],
                            preferred_element_type=jnp.float32)
                    + bk_ref[0]).astype(kp_ref.dtype)
    vp_ref[0, 0] = (jnp.dot(v_ref[0], wv_ref[0],
                            preferred_element_type=jnp.float32)
                    + bv_ref[0]).astype(vp_ref.dtype)


# ---------------------------------------------------------------------------
# Kernel 2: flash attention + fused output projection.
# grid = (B, Sq/tq, H, Sk/tk); head & key-tile axes are reductions.
# ---------------------------------------------------------------------------
def _flash_kernel(qp_ref, kp_ref, vp_ref, wp_ref, bp_ref, o_ref,
                  m_sc, l_sc, acc_sc, out_sc):
    h = pl.program_id(2)
    ki = pl.program_id(3)
    n_h = pl.num_programs(2)
    n_k = pl.num_programs(3)

    @pl.when((h == 0) & (ki == 0))
    def _():
        out_sc[...] = jnp.zeros(out_sc.shape, out_sc.dtype)

    @pl.when(ki == 0)
    def _():
        m_sc[...] = jnp.full(m_sc.shape, -jnp.inf, m_sc.dtype)
        l_sc[...] = jnp.zeros(l_sc.shape, l_sc.dtype)
        acc_sc[...] = jnp.zeros(acc_sc.shape, acc_sc.dtype)

    q = qp_ref[0, 0]                      # (tq, Qd) bf16  (scale folded in)
    k = kp_ref[0, 0]                      # (tk, Kd) bf16
    v = vp_ref[0, 0]                      # (tk, Vd) bf16

    # scores = q @ k^T by contracting the last dims (no explicit transpose)
    s = jax.lax.dot_general(q, k, (((1,), (1,)), ((), ())),
                            preferred_element_type=jnp.float32)   # (tq, tk) f32

    # online softmax update
    m_prev = m_sc[...]
    m_new = jnp.maximum(m_prev, jnp.max(s, axis=-1, keepdims=True))
    alpha = jnp.exp(m_prev - m_new)
    p = jnp.exp(s - m_new)
    l_sc[...] = alpha * l_sc[...] + jnp.sum(p, axis=-1, keepdims=True)
    acc_sc[...] = alpha * acc_sc[...] + jnp.dot(
        p.astype(jnp.bfloat16), v, preferred_element_type=jnp.float32)
    m_sc[...] = m_new

    # last key tile of this head: normalize and fold into the output proj.
    @pl.when(ki == n_k - 1)
    def _():
        head = acc_sc[...] * pl.reciprocal(l_sc[...], approx=True)
        out_sc[...] = out_sc[...] + jnp.dot(
            head.astype(jnp.bfloat16), wp_ref[0],
            preferred_element_type=jnp.float32)

    # last head & last key tile: add bias, one lane-dense bf16 store.
    @pl.when((h == n_h - 1) & (ki == n_k - 1))
    def _():
        o_ref[0] = (out_sc[...] + bp_ref[...]).astype(o_ref.dtype)


# ---------------------------------------------------------------------------
# Wrapper: pack weights head-major, launch projection + flash kernels.
# ---------------------------------------------------------------------------
def multihead_attention_forward(query, key, value, params,
                                block_q=256, block_kv=512):
    wq, bq = params["wq"], params["bq"]      # (H, Qd, D), (H, Qd)
    wk, bk = params["wk"], params["bk"]      # (H, Kd, D), (H, Kd)
    wv, bv = params["wv"], params["bv"]      # (H, Vd, D), (H, Vd)
    wp, bp = params["wp"], params["bp"]      # (Dm, H*Vd), (Dm,)

    H, Qd, D = wq.shape
    _, Kd, _ = wk.shape
    _, Vd, _ = wv.shape
    B, Sq, _ = query.shape
    _, Sk, _ = key.shape
    Dm = wp.shape[0]

    scale = 1.0 / math.sqrt(Kd)

    # Head-major weight packing: (H, D, head_dim) so each head is a full
    # BlockSpec block (no sub-128-lane slicing).  Fold score scale into Wq.
    wq_h = (jnp.transpose(wq, (0, 2, 1)) * scale).astype(jnp.bfloat16)   # (H, D, Qd)
    wk_h = jnp.transpose(wk, (0, 2, 1)).astype(jnp.bfloat16)             # (H, D, Kd)
    wv_h = jnp.transpose(wv, (0, 2, 1)).astype(jnp.bfloat16)             # (H, D, Vd)
    bq_h = (bq.reshape(H, 1, Qd) * scale).astype(jnp.float32)
    bk_h = bk.reshape(H, 1, Kd).astype(jnp.float32)
    bv_h = bv.reshape(H, 1, Vd).astype(jnp.float32)
    wp_h = wp.T.reshape(H, Vd, Dm).astype(jnp.bfloat16)                  # (H, Vd, Dm)
    bp2 = bp.reshape(1, Dm).astype(jnp.float32)

    q_bf = query.astype(jnp.bfloat16)
    k_bf = key.astype(jnp.bfloat16)
    v_bf = value.astype(jnp.bfloat16)

    # -------------------- 1) hoisted per-head projections --------------------
    hd_pad = (_round_up(Qd, LANE) + _round_up(Kd, LANE) + _round_up(Vd, LANE))
    proj_step_bytes = 2 * (
        (Sq + 2 * Sk) * _round_up(D, LANE) * _BF16
        + D * hd_pad * _BF16 + hd_pad * _F32
        + (Sq * _round_up(Qd, LANE) + Sk * _round_up(Kd, LANE)
           + Sk * _round_up(Vd, LANE)) * _BF16)
    proj_vmem = int(min(64 * 1024 * 1024,
                        max(8 * 1024 * 1024, 2 * proj_step_bytes)))

    proj_cost = pl.CostEstimate(
        flops=2 * B * H * (Sq * D * Qd + Sk * D * Kd + Sk * D * Vd),
        transcendentals=0,
        bytes_accessed=int(B * H * (Sq + 2 * Sk) * D * _BF16
                           + H * D * (Qd + Kd + Vd) * _BF16
                           + B * H * (Sq * Qd + Sk * Kd + Sk * Vd) * _BF16))

    qp, kp, vp = pl.pallas_call(
        _proj_kernel,
        out_shape=(jax.ShapeDtypeStruct((B, H, Sq, Qd), jnp.bfloat16),
                   jax.ShapeDtypeStruct((B, H, Sk, Kd), jnp.bfloat16),
                   jax.ShapeDtypeStruct((B, H, Sk, Vd), jnp.bfloat16)),
        grid_spec=pltpu.PrefetchScalarGridSpec(
            num_scalar_prefetch=0,
            grid=(B, H),
            in_specs=[
                pl.BlockSpec((1, Sq, D), lambda b, h: (b, 0, 0)),   # query
                pl.BlockSpec((1, Sk, D), lambda b, h: (b, 0, 0)),   # key
                pl.BlockSpec((1, Sk, D), lambda b, h: (b, 0, 0)),   # value
                pl.BlockSpec((1, D, Qd), lambda b, h: (h, 0, 0)),   # Wq (scaled)
                pl.BlockSpec((1, 1, Qd), lambda b, h: (h, 0, 0)),   # bq (scaled)
                pl.BlockSpec((1, D, Kd), lambda b, h: (h, 0, 0)),   # Wk
                pl.BlockSpec((1, 1, Kd), lambda b, h: (h, 0, 0)),   # bk
                pl.BlockSpec((1, D, Vd), lambda b, h: (h, 0, 0)),   # Wv
                pl.BlockSpec((1, 1, Vd), lambda b, h: (h, 0, 0)),   # bv
            ],
            out_specs=(
                pl.BlockSpec((1, 1, Sq, Qd), lambda b, h: (b, h, 0, 0)),
                pl.BlockSpec((1, 1, Sk, Kd), lambda b, h: (b, h, 0, 0)),
                pl.BlockSpec((1, 1, Sk, Vd), lambda b, h: (b, h, 0, 0)),
            )),
        compiler_params=pltpu.CompilerParams(
            dimension_semantics=("parallel", "parallel"),
            vmem_limit_bytes=proj_vmem),
        cost_estimate=proj_cost,
    )(q_bf, k_bf, v_bf, wq_h, bq_h, wk_h, bk_h, wv_h, bv_h)

    # -------------------- 2) flash attention + fused output proj -------------
    tq = _pick_tile(Sq, block_q)
    tk = _pick_tile(Sk, block_kv)
    n_q = Sq // tq
    n_k = Sk // tk

    flash_step_bytes = 2 * (
        tq * _round_up(Qd, LANE) * _BF16
        + tk * (_round_up(Kd, LANE) + _round_up(Vd, LANE)) * _BF16
        + Vd * _round_up(Dm, LANE) * _BF16 + _round_up(Dm, LANE) * _F32
        + tq * _round_up(Dm, LANE) * _BF16)
    flash_scratch_bytes = (2 * tq * LANE + tq * _round_up(Vd, LANE)
                           + tq * _round_up(Dm, LANE)) * _F32
    flash_vmem = int(min(64 * 1024 * 1024,
                         max(8 * 1024 * 1024,
                             2 * (flash_step_bytes + flash_scratch_bytes))))

    attn_cost = pl.CostEstimate(
        flops=2 * B * H * Sq * Sk * (Kd + Vd) + 2 * B * Sq * H * Vd * Dm,
        transcendentals=B * H * Sq * Sk,
        bytes_accessed=int(B * H * (Sq * Qd + Sk * Kd + Sk * Vd) * _BF16
                           + H * Vd * Dm * _BF16 + Dm * _F32
                           + B * Sq * Dm * _BF16))

    out = pl.pallas_call(
        _flash_kernel,
        out_shape=jax.ShapeDtypeStruct((B, Sq, Dm), jnp.bfloat16),
        grid_spec=pltpu.PrefetchScalarGridSpec(
            num_scalar_prefetch=0,
            grid=(B, n_q, H, n_k),
            in_specs=[
                pl.BlockSpec((1, 1, tq, Qd), lambda b, qi, h, ki: (b, h, qi, 0)),
                pl.BlockSpec((1, 1, tk, Kd), lambda b, qi, h, ki: (b, h, ki, 0)),
                pl.BlockSpec((1, 1, tk, Vd), lambda b, qi, h, ki: (b, h, ki, 0)),
                pl.BlockSpec((1, Vd, Dm),    lambda b, qi, h, ki: (h, 0, 0)),
                pl.BlockSpec((1, Dm),        lambda b, qi, h, ki: (0, 0)),
            ],
            out_specs=pl.BlockSpec((1, tq, Dm), lambda b, qi, h, ki: (b, qi, 0)),
            scratch_shapes=[
                pltpu.VMEM((tq, 1), jnp.float32),    # m  (running max)
                pltpu.VMEM((tq, 1), jnp.float32),    # l  (running denom)
                pltpu.VMEM((tq, Vd), jnp.float32),   # per-head attention acc
                pltpu.VMEM((tq, Dm), jnp.float32),   # fused output-proj acc
            ]),
        compiler_params=pltpu.CompilerParams(
            dimension_semantics=("parallel", "parallel", "arbitrary", "arbitrary"),
            vmem_limit_bytes=flash_vmem),
        cost_estimate=attn_cost,
    )(qp, kp, vp, wp_h, bp2)

    return out


# ---------------------------------------------------------------------------
# Pure-JAX f32 reference (mirrors the PyTorch module exactly)
# ---------------------------------------------------------------------------
def reference_forward(query, key, value, params):
    outs = []
    H = params["wq"].shape[0]
    for h in range(H):
        Q = query @ params["wq"][h].T + params["bq"][h]
        K = key @ params["wk"][h].T + params["bk"][h]
        V = value @ params["wv"][h].T + params["bv"][h]
        score = jnp.einsum("bqd,bkd->bqk", Q, K) / (K.shape[-1] ** 0.5)
        attn = jax.nn.softmax(score, axis=-1)
        outs.append(jnp.einsum("bqk,bkd->bqd", attn, V))
    concat = jnp.concatenate(outs, axis=-1)
    return concat @ params["wp"].T + params["bp"]


if __name__ == "__main__":
    # Small, module-consistent shapes.
    num_heads = 2
    model_dim = 32
    Q_dim = 16
    K_dim = 16   # must equal Q_dim for bmm(Q, K^T)
    V_dim = 16
    batch = 2
    seq_q = 8
    seq_k = 8

    key0 = jax.random.PRNGKey(0)
    keys = jax.random.split(key0, 12)

    def init_linear(k, out_dim, in_dim):
        bound = 1.0 / math.sqrt(in_dim)
        kw, kb = jax.random.split(k)
        w = jax.random.uniform(kw, (out_dim, in_dim), jnp.float32, -bound, bound)
        b = jax.random.uniform(kb, (out_dim,), jnp.float32, -bound, bound)
        return w, b

    wq = jnp.stack([init_linear(keys[h], Q_dim, model_dim)[0] for h in range(num_heads)])
    bq = jnp.stack([init_linear(keys[h], Q_dim, model_dim)[1] for h in range(num_heads)])
    wk = jnp.stack([init_linear(keys[2 + h], K_dim, model_dim)[0] for h in range(num_heads)])
    bk = jnp.stack([init_linear(keys[2 + h], K_dim, model_dim)[1] for h in range(num_heads)])
    wv = jnp.stack([init_linear(keys[4 + h], V_dim, model_dim)[0] for h in range(num_heads)])
    bv = jnp.stack([init_linear(keys[4 + h], V_dim, model_dim)[1] for h in range(num_heads)])
    wp, bp = init_linear(keys[6], model_dim, num_heads * V_dim)

    params = {"wq": wq, "bq": bq, "wk": wk, "bk": bk,
              "wv": wv, "bv": bv, "wp": wp, "bp": bp}

    query = jax.random.normal(keys[7], (batch, seq_q, model_dim), jnp.float32)
    key_in = jax.random.normal(keys[8], (batch, seq_k, model_dim), jnp.float32)
    value = jax.random.normal(keys[9], (batch, seq_k, model_dim), jnp.float32)

    out = multihead_attention_forward(query, key_in, value, params)
    out = jax.block_until_ready(out)

    ref = reference_forward(query, key_in, value, params)
    assert out.shape == (batch, seq_q, model_dim)
    # bf16 MXU operands + bf16 output + approx reciprocal vs f32 reference
    assert jnp.allclose(out.astype(jnp.float32), ref, atol=5e-2, rtol=5e-2), \
        "mismatch vs reference"

    print("KERNEL_OK")
</pallas_src>

<mosaic_0001>
module attributes {stable_mosaic.version = 11 : i64} {
  func.func @_proj_kernel(%arg0: i32, %arg1: i32, %arg2: memref<1x8x32xbf16, #tpu.memory_space<vmem>>, %arg3: memref<1x8x32xbf16, #tpu.memory_space<vmem>>, %arg4: memref<1x8x32xbf16, #tpu.memory_space<vmem>>, %arg5: memref<1x32x16xbf16, #tpu.memory_space<vmem>>, %arg6: memref<1x1x16xf32, #tpu.memory_space<vmem>>, %arg7: memref<1x32x16xbf16, #tpu.memory_space<vmem>>, %arg8: memref<1x1x16xf32, #tpu.memory_space<vmem>>, %arg9: memref<1x32x16xbf16, #tpu.memory_space<vmem>>, %arg10: memref<1x1x16xf32, #tpu.memory_space<vmem>>, %arg11: memref<1x1x8x16xbf16, #tpu.memory_space<vmem>>, %arg12: memref<1x1x8x16xbf16, #tpu.memory_space<vmem>>, %arg13: memref<1x1x8x16xbf16, #tpu.memory_space<vmem>>) attributes {dimension_semantics = [#tpu.dimension_semantics<parallel>, #tpu.dimension_semantics<parallel>], iteration_bounds = array<i64: 2, 2>, scalar_prefetch = 0 : i64, scratch_operands = 0 : i64, tpu.core_type = #tpu.core_type<tc>, window_params = [{transform_indices = @transform_0, window_bounds = array<i64: 1, 8, 32>}, {transform_indices = @transform_1, window_bounds = array<i64: 1, 8, 32>}, {transform_indices = @transform_2, window_bounds = array<i64: 1, 8, 32>}, {transform_indices = @transform_3, window_bounds = array<i64: 1, 32, 16>}, {transform_indices = @transform_4, window_bounds = array<i64: 1, 1, 16>}, {transform_indices = @transform_5, window_bounds = array<i64: 1, 32, 16>}, {transform_indices = @transform_6, window_bounds = array<i64: 1, 1, 16>}, {transform_indices = @transform_7, window_bounds = array<i64: 1, 32, 16>}, {transform_indices = @transform_8, window_bounds = array<i64: 1, 1, 16>}, {transform_indices = @transform_9, window_bounds = array<i64: 1, 1, 8, 16>}, {transform_indices = @transform_10, window_bounds = array<i64: 1, 1, 8, 16>}, {transform_indices = @transform_11, window_bounds = array<i64: 1, 1, 8, 16>}]} {
    %c0 = arith.constant 0 : index
    %c0_0 = arith.constant 0 : index
    %c0_1 = arith.constant 0 : index
    %0 = vector.load %arg2[%c0, %c0_0, %c0_1] : memref<1x8x32xbf16, #tpu.memory_space<vmem>>, vector<1x8x32xbf16>
    %1 = vector.shape_cast %0 : vector<1x8x32xbf16> to vector<8x32xbf16>
    %c0_2 = arith.constant 0 : index
    %c0_3 = arith.constant 0 : index
    %c0_4 = arith.constant 0 : index
    %2 = vector.load %arg5[%c0_2, %c0_3, %c0_4] : memref<1x32x16xbf16, #tpu.memory_space<vmem>>, vector<1x32x16xbf16>
    %3 = vector.shape_cast %2 : vector<1x32x16xbf16> to vector<32x16xbf16>
    %cst = arith.constant dense<0.000000e+00> : vector<8x16xf32>
    %4 = tpu.matmul %1, %3, %cst {dimension_numbers = #tpu.dot_dimension_numbers<[1], [0], [0], [1], [0, 0, 1, 1], [], []>} : vector<8x32xbf16>, vector<32x16xbf16>, vector<8x16xf32> -> vector<8x16xf32>
    %c0_5 = arith.constant 0 : index
    %c0_6 = arith.constant 0 : index
    %c0_7 = arith.constant 0 : index
    %5 = vector.load %arg6[%c0_5, %c0_6, %c0_7] : memref<1x1x16xf32, #tpu.memory_space<vmem>>, vector<1x1x16xf32>
    %6 = vector.shape_cast %5 : vector<1x1x16xf32> to vector<1x16xf32>
    %7 = vector.broadcast %6 : vector<1x16xf32> to vector<8x16xf32>
    %8 = arith.addf %4, %7 : vector<8x16xf32>
    %9 = arith.truncf %8 : vector<8x16xf32> to vector<8x16xbf16>
    %c0_8 = arith.constant 0 : index
    %c0_9 = arith.constant 0 : index
    %c0_10 = arith.constant 0 : index
    %c0_11 = arith.constant 0 : index
    %10 = vector.load %arg11[%c0_8, %c0_9, %c0_10, %c0_11] : memref<1x1x8x16xbf16, #tpu.memory_space<vmem>>, vector<1x1x8x16xbf16>
    %11 = vector.shape_cast %10 : vector<1x1x8x16xbf16> to vector<8x16xbf16>
    %12 = vector.shape_cast %9 : vector<8x16xbf16> to vector<1x1x8x16xbf16>
    tpu.vector_store %arg11[%c0_8, %c0_9, %c0_10, %c0_11], %12 {strides = array<i32>} : memref<1x1x8x16xbf16, #tpu.memory_space<vmem>>, vector<1x1x8x16xbf16>,
    %c0_12 = arith.constant 0 : index
    %c0_13 = arith.constant 0 : index
    %c0_14 = arith.constant 0 : index
    %13 = vector.load %arg3[%c0_12, %c0_13, %c0_14] : memref<1x8x32xbf16, #tpu.memory_space<vmem>>, vector<1x8x32xbf16>
    %14 = vector.shape_cast %13 : vector<1x8x32xbf16> to vector<8x32xbf16>
    %c0_15 = arith.constant 0 : index
    %c0_16 = arith.constant 0 : index
    %c0_17 = arith.constant 0 : index
    %15 = vector.load %arg7[%c0_15, %c0_16, %c0_17] : memref<1x32x16xbf16, #tpu.memory_space<vmem>>, vector<1x32x16xbf16>
    %16 = vector.shape_cast %15 : vector<1x32x16xbf16> to vector<32x16xbf16>
    %cst_18 = arith.constant dense<0.000000e+00> : vector<8x16xf32>
    %17 = tpu.matmul %14, %16, %cst_18 {dimension_numbers = #tpu.dot_dimension_numbers<[1], [0], [0], [1], [0, 0, 1, 1], [], []>} : vector<8x32xbf16>, vector<32x16xbf16>, vector<8x16xf32> -> vector<8x16xf32>
    %c0_19 = arith.constant 0 : index
    %c0_20 = arith.constant 0 : index
    %c0_21 = arith.constant 0 : index
    %18 = vector.load %arg8[%c0_19, %c0_20, %c0_21] : memref<1x1x16xf32, #tpu.memory_space<vmem>>, vector<1x1x16xf32>
    %19 = vector.shape_cast %18 : vector<1x1x16xf32> to vector<1x16xf32>
    %20 = vector.broadcast %19 : vector<1x16xf32> to vector<8x16xf32>
    %21 = arith.addf %17, %20 : vector<8x16xf32>
    %22 = arith.truncf %21 : vector<8x16xf32> to vector<8x16xbf16>
    %c0_22 = arith.constant 0 : index
    %c0_23 = arith.constant 0 : index
    %c0_24 = arith.constant 0 : index
    %c0_25 = arith.constant 0 : index
    %23 = vector.load %arg12[%c0_22, %c0_23, %c0_24, %c0_25] : memref<1x1x8x16xbf16, #tpu.memory_space<vmem>>, vector<1x1x8x16xbf16>
    %24 = vector.shape_cast %23 : vector<1x1x8x16xbf16> to vector<8x16xbf16>
    %25 = vector.shape_cast %22 : vector<8x16xbf16> to vector<1x1x8x16xbf16>
    tpu.vector_store %arg12[%c0_22, %c0_23, %c0_24, %c0_25], %25 {strides = array<i32>} : memref<1x1x8x16xbf16, #tpu.memory_space<vmem>>, vector<1x1x8x16xbf16>,
    %c0_26 = arith.constant 0 : index
    %c0_27 = arith.constant 0 : index
    %c0_28 = arith.constant 0 : index
    %26 = vector.load %arg4[%c0_26, %c0_27, %c0_28] : memref<1x8x32xbf16, #tpu.memory_space<vmem>>, vector<1x8x32xbf16>
    %27 = vector.shape_cast %26 : vector<1x8x32xbf16> to vector<8x32xbf16>
    %c0_29 = arith.constant 0 : index
    %c0_30 = arith.constant 0 : index
    %c0_31 = arith.constant 0 : index
    %28 = vector.load %arg9[%c0_29, %c0_30, %c0_31] : memref<1x32x16xbf16, #tpu.memory_space<vmem>>, vector<1x32x16xbf16>
    %29 = vector.shape_cast %28 : vector<1x32x16xbf16> to vector<32x16xbf16>
    %cst_32 = arith.constant dense<0.000000e+00> : vector<8x16xf32>
    %30 = tpu.matmul %27, %29, %cst_32 {dimension_numbers = #tpu.dot_dimension_numbers<[1], [0], [0], [1], [0, 0, 1, 1], [], []>} : vector<8x32xbf16>, vector<32x16xbf16>, vector<8x16xf32> -> vector<8x16xf32>
    %c0_33 = arith.constant 0 : index
    %c0_34 = arith.constant 0 : index
    %c0_35 = arith.constant 0 : index
    %31 = vector.load %arg10[%c0_33, %c0_34, %c0_35] : memref<1x1x16xf32, #tpu.memory_space<vmem>>, vector<1x1x16xf32>
    %32 = vector.shape_cast %31 : vector<1x1x16xf32> to vector<1x16xf32>
    %33 = vector.broadcast %32 : vector<1x16xf32> to vector<8x16xf32>
    %34 = arith.addf %30, %33 : vector<8x16xf32>
    %35 = arith.truncf %34 : vector<8x16xf32> to vector<8x16xbf16>
    %c0_36 = arith.constant 0 : index
    %c0_37 = arith.constant 0 : index
    %c0_38 = arith.constant 0 : index
    %c0_39 = arith.constant 0 : index
    %36 = vector.load %arg13[%c0_36, %c0_37, %c0_38, %c0_39] : memref<1x1x8x16xbf16, #tpu.memory_space<vmem>>, vector<1x1x8x16xbf16>
    %37 = vector.shape_cast %36 : vector<1x1x8x16xbf16> to vector<8x16xbf16>
    %38 = vector.shape_cast %35 : vector<8x16xbf16> to vector<1x1x8x16xbf16>
    tpu.vector_store %arg13[%c0_36, %c0_37, %c0_38, %c0_39], %38 {strides = array<i32>} : memref<1x1x8x16xbf16, #tpu.memory_space<vmem>>, vector<1x1x8x16xbf16>,
    return
  }
  func.func @transform_0(%arg0: i32, %arg1: i32) -> (i32, i32, i32) {
    %c0_i32 = arith.constant 0 : i32
    %c0_i32_0 = arith.constant 0 : i32
    %c0_i32_1 = arith.constant 0 : i32
    return %arg0, %c0_i32, %c0_i32_0 : i32, i32, i32
  }
  func.func @transform_1(%arg0: i32, %arg1: i32) -> (i32, i32, i32) {
    %c0_i32 = arith.constant 0 : i32
    %c0_i32_0 = arith.constant 0 : i32
    %c0_i32_1 = arith.constant 0 : i32
    return %arg0, %c0_i32, %c0_i32_0 : i32, i32, i32
  }
  func.func @transform_2(%arg0: i32, %arg1: i32) -> (i32, i32, i32) {
    %c0_i32 = arith.constant 0 : i32
    %c0_i32_0 = arith.constant 0 : i32
    %c0_i32_1 = arith.constant 0 : i32
    return %arg0, %c0_i32, %c0_i32_0 : i32, i32, i32
  }
  func.func @transform_3(%arg0: i32, %arg1: i32) -> (i32, i32, i32) {
    %c0_i32 = arith.constant 0 : i32
    %c0_i32_0 = arith.constant 0 : i32
    %c0_i32_1 = arith.constant 0 : i32
    return %arg1, %c0_i32, %c0_i32_0 : i32, i32, i32
  }
  func.func @transform_4(%arg0: i32, %arg1: i32) -> (i32, i32, i32) {
    %c0_i32 = arith.constant 0 : i32
    %c0_i32_0 = arith.constant 0 : i32
    %c0_i32_1 = arith.constant 0 : i32
    return %arg1, %c0_i32, %c0_i32_0 : i32, i32, i32
  }
  func.func @transform_5(%arg0: i32, %arg1: i32) -> (i32, i32, i32) {
    %c0_i32 = arith.constant 0 : i32
    %c0_i32_0 = arith.constant 0 : i32
    %c0_i32_1 = arith.constant 0 : i32
    return %arg1, %c0_i32, %c0_i32_0 : i32, i32, i32
  }
  func.func @transform_6(%arg0: i32, %arg1: i32) -> (i32, i32, i32) {
    %c0_i32 = arith.constant 0 : i32
    %c0_i32_0 = arith.constant 0 : i32
    %c0_i32_1 = arith.constant 0 : i32
    return %arg1, %c0_i32, %c0_i32_0 : i32, i32, i32
  }
  func.func @transform_7(%arg0: i32, %arg1: i32) -> (i32, i32, i32) {
    %c0_i32 = arith.constant 0 : i32
    %c0_i32_0 = arith.constant 0 : i32
    %c0_i32_1 = arith.constant 0 : i32
    return %arg1, %c0_i32, %c0_i32_0 : i32, i32, i32
  }
  func.func @transform_8(%arg0: i32, %arg1: i32) -> (i32, i32, i32) {
    %c0_i32 = arith.constant 0 : i32
    %c0_i32_0 = arith.constant 0 : i32
    %c0_i32_1 = arith.constant 0 : i32
    return %arg1, %c0_i32, %c0_i32_0 : i32, i32, i32
  }
  func.func @transform_9(%arg0: i32, %arg1: i32) -> (i32, i32, i32, i32) {
    %c0_i32 = arith.constant 0 : i32
    %c0_i32_0 = arith.constant 0 : i32
    %c0_i32_1 = arith.constant 0 : i32
    return %arg0, %arg1, %c0_i32, %c0_i32_0 : i32, i32, i32, i32
  }
  func.func @transform_10(%arg0: i32, %arg1: i32) -> (i32, i32, i32, i32) {
    %c0_i32 = arith.constant 0 : i32
    %c0_i32_0 = arith.constant 0 : i32
    %c0_i32_1 = arith.constant 0 : i32
    return %arg0, %arg1, %c0_i32, %c0_i32_0 : i32, i32, i32, i32
  }
  func.func @transform_11(%arg0: i32, %arg1: i32) -> (i32, i32, i32, i32) {
    %c0_i32 = arith.constant 0 : i32
    %c0_i32_0 = arith.constant 0 : i32
    %c0_i32_1 = arith.constant 0 : i32
    return %arg0, %arg1, %c0_i32, %c0_i32_0 : i32, i32, i32, i32
  }
}

</mosaic_0001>

<bundles_post_ra>
// kernel: tpu_custom_call.1
= control target key start
LH: loop header
LB: loop body
LE: loop exit
PB: predicated region body
PF: predicated region fallthrough
CT: control target
= control target key end

     0   :  { %s1693_s0 = inlined_call_operand.vmem [shape: bf16[2,8,32], index: 0, kind: input, shape index: {}]   ;;  %s1694_s1 = inlined_call_operand.vmem [shape: bf16[2,8,32], index: 1, kind: input, shape index: {}]   ;;  %s1695_s2 = inlined_call_operand.vmem [shape: bf16[2,8,32], index: 2, kind: input, shape index: {}]   ;;  %s1696_s3 = inlined_call_operand.vmem [shape: bf16[2,32,16], index: 3, kind: input, shape index: {}]   ;;  %s1697_s4 = inlined_call_operand.vmem [shape: f32[2,1,16], index: 4, kind: input, shape index: {}]   ;;  %s1698_s5 = inlined_call_operand.vmem [shape: bf16[2,32,16], index: 5, kind: input, shape index: {}]   ;;  %s1699_s6 = inlined_call_operand.vmem [shape: f32[2,1,16], index: 6, kind: input, shape index: {}]   ;;  %s1700_s7 = inlined_call_operand.vmem [shape: bf16[2,32,16], index: 7, kind: input, shape index: {}]   ;;  %s1701_s8 = inlined_call_operand.vmem [shape: f32[2,1,16], index: 8, kind: input, shape index: {}]   ;;  %s1702_s9 = inlined_call_operand.hbm [shape: bf16[2,2,8,16], index: 9, kind: output, shape index: {0}]   ;;  %s1703_s10 = inlined_call_operand.hbm [shape: bf16[2,2,8,16], index: 10, kind: output, shape index: {1}]   ;;  %s1704_s11 = inlined_call_operand.hbm [shape: bf16[2,2,8,16], index: 11, kind: output, shape index: {2}]  }
   0x1   :  { %1717 = sst [smem:[#allocation17_spill]] %s1703_s10 }
   0x2   :  { %1718 = sst [smem:[#allocation18_spill]] %s1704_s11 }
   0x3   :  { %17 = vsyncpa [#allocation3], 0 }
   0x4   :  { %19 = vsyncpa [#allocation3 + $0x1], 0 }
   0x5   :  { %20 = vsyncpa [#allocation5], 0 }
   0x6   :  { %22 = vsyncpa [#allocation5 + $0x1], 0  ;;  %s1430_s17 = smov 0   ;;  %s1432_s18 = smov 0  }
   0x7   :  { %s1434_s19 = smov 0   ;;  %s1436_s20 = smov 0  }
   0x8   :  { %s1438_s21 = smov 0   ;;  %s1440_s22 = smov 0  }
   0x9   :  { %s1442_s23 = smov 0   ;;  %s1444_s24 = smov 0  }
   0xa LB: > { %1719 = sst [smem:[#allocation9_spill]] %s1335_s17  ;;  %s1706_s25 = sadd.s32 4294967295, %s1363_s24   ;;  %s1363_s24 = sphi %s1444_s24, %s28_s24   ;;  %s1359_s23 = sphi %s1442_s23, %s1742_s23   ;;  %s1355_s22 = sphi %s1440_s22, %s1741_s22   ;;  %s1351_s21 = sphi %s1438_s21, %s1740_s21   ;;  %s1347_s20 = sphi %s1436_s20, %s1739_s20   ;;  %s1343_s19 = sphi %s1434_s19, %s1738_s19   ;;  %s1339_s18 = sphi %s1432_s18, %s1744_s18   ;;  %s1335_s17 = sphi %s1430_s17, %s1743_s17  }
   0xb   : > { %1720 = sst [smem:[#allocation10_spill]] %s1343_s19  ;;  %s1705_s26 = sadd.s32 4294967294, %s1363_s24  }
   0xc   : > { %1721 = sst [smem:[#allocation11_spill]] %s1355_s22  ;;  %s37_s27 = sadd.s32 1, %s1355_s22 }
   0xd   : > { %1722 = sst [smem:[#allocation12_spill]] %s1359_s23  ;;  %p38_p0 = scmp.ge.s32.totalorder %s37_s27, 2 }
   0xe   : > { %s40_s28 = sadd.s32 1, %s1359_s23  ;;  %p293_p1 = scmp.ne.s32.totalorder %s1343_s19, %s1339_s18 }
   0xf   : > { %p294_p2 = scmp.eq.s32.totalorder %s1706_s25, 3  ;;  %s1746_s27 = smov (%p38_p0, %s37_s27), 0 }
  0x10   : > { %1723 = sst [smem:[#allocation13_spill]] %s1746_s27  ;;  %s1748_s28 = smov (!%p38_p0, %s40_s28), %s1359_s23 }
  0x11   : > { %s279_s29 = ssub.s32 %s1355_s22, %s1746_s27  ;;  %p1483_p3 = por %p294_p2, %p293_p1 }
  0x12   : > { %p42_p4 = scmp.ge.s32.totalorder %s1748_s28, 2  ;;  %p299_p5 = scmp.ne.s32.totalorder %s1339_s18, %s1335_s17 }
  0x13   : > { %p300_p6 = scmp.eq.s32.totalorder %s1705_s26, 3  ;;  %p1048_p7 = scmp.ge.s32.totalorder %s1363_s24, 1 }
  0x14   : > { %s1750_s28 = smov (%p42_p4, %s1748_s28), 0  ;;  %p437_p9 = scmp.lt.s32.totalorder %s1363_s24, 5 }
  0x15   : > { %1725 = sst [smem:[#allocation14_spill]] %s1750_s28  ;;  %p1494_p8 = por %p300_p6, %p299_p5 }
  0x16   : > { %s278_s13 = ssub.s32 %s1359_s23, %s1750_s28  ;;  %s283_s14 = sadd.s32 1, %s1343_s19 }
  0x17   : > { %s1726_s12 = scalar_select %p1494_p8, 1, 0 }
  0x18   : > { %s280_s15 = sor.u32 %s279_s29, %s278_s13  ;;  %p438_p10 = pnand %p1048_p7, %p437_p9 }
  0x19   : > { %1727 = sst [smem:[#allocation15_spill]] %s1726_s12  ;;  %p281_p11 = scmp.eq.s32.totalorder %s280_s15, 0  ;;  %v1365_v0 = vmov (!%p438_p10), 0.0   ;;  %vm1366_vm0 = vmmov (!%p438_p10), 0   ;;  %vm579_vm1 = vcmask (!%p438_p10), 261120   ;;  %vm624_vm2 = vcmask (!%p438_p10), 125952  }
  0x1a   : > { %441 = sbr.rel (%p438_p10) target bundleno = 323 (0x143), region = 56  ;;  %p530_p12 = scmp.lt.s32.totalorder (!%p438_p10), %s1347_s20, 1  ;;  %1096 = vmatprep.subr.bf16.mxu0 (!%p438_p10), %v1365_v0  ;;  %1104 = vmatprep.subr.bf16.mxu1 (!%p438_p10), %v1365_v0 }
  0x1b   : > { %s1503_s16 = scalar_select %p281_p11, %s1343_s19, %s283_s14  }
  0x1c   : > { %p518_p13 = scmp.lt.s32.totalorder (!%p438_p10), %s1351_s21, 1  ;;  %1100 = vmatprep.mubr.msk.bf16.mxu0 (!%p438_p10), %vm1366_vm0, %v1365_v0  ;;  %1108 = vmatprep.mubr.msk.bf16.mxu1 (!%p438_p10), %vm1366_vm0, %v1365_v0  ;;  %s501_s19 = sand.u32 (!%p438_p10), 1, %s1339_s18  }
  0x1d   : > { %1728 = sst [smem:[#allocation16_spill]] %s1503_s16 }
  0x21   : > { %s1508_s26 = scalar_select %p530_p12, %s1347_s20, 1 }
  0x22   : > { %s519_s29 = scalar_select %p518_p13, %s1351_s21, 1 }
  0x23   : > { %s1084_s13 = sshll.u32 %s1508_s26, 4  ;;  %s537_s16 = scalar_lea.vmem %s1697_s4, %s1508_s26 }
  0x24   : > { %s534_s25 = scalar_lea.vmem %s1696_s3, %s1084_s13  ;;  %s542_s23 = scalar_lea.vmem %s1698_s5, %s1084_s13  ;;  %v1061_v10 = vld [vmem:[%s537_s16] ss:$0 sm:$0xff] }
  0x25   : > { %v1203_v1 = vld [vmem:[%s534_s25] sm:$0xff]   ;;  %s1052_s22 = sshll.u32 %s519_s29, 2  ;;  %v1204_v2 = vld [vmem:[%s534_s25 + $0x8] sm:$0xff]   ;;  %s550_s12 = scalar_lea.vmem %s1700_s7, %s1084_s13 }
  0x26   : > { %1097 = vmatpush3.bf16.msra.mxu0 %v1203_v1  ;;  %v1205_v3 = vld [vmem:[%s542_s23] sm:$0xff]   ;;  %s521_s10 = scalar_lea.vmem %s1693_s0, %s1052_s22  ;;  %v1207_v4 = vld [vmem:[%s542_s23 + $0x8] sm:$0xff]   ;;  %s525_s27 = scalar_lea.vmem %s1694_s1, %s1052_s22 }
  0x27   : > { %1098 = vmatprep.subr.bf16.mxu0 %v1365_v0  ;;  %1105 = vmatpush3.bf16.msra.mxu1 %v1205_v3  ;;  %v555_v5 = vld [vmem:[%s521_s10] sm:$0xf]  ;;  %v1208_v8 = vld [vmem:[%s550_s12 + $0x8] sm:$0xff]   ;;  %s529_s17 = scalar_lea.vmem %s1695_s2, %s1052_s22  ;;  %s1076_s23 = sshll.u32 %s1351_s21, 1 }
  0x28   : > { %1106 = vmatprep.subr.bf16.mxu1 %v1365_v0  ;;  %v1206_v6 = vld [vmem:[%s550_s12] sm:$0xff]   ;;  %s1541_s12 = sshll.u32 %s501_s19, 2  ;;  %s545_s22 = scalar_lea.vmem %s1699_s6, %s1508_s26 }
  0x29   : > { %v626_v7 = vld [vmem:[%s525_s27] sm:$0xf]  ;;  %s786_s14 = sadd.s32 %s1347_s20, %s1076_s23  ;;  %s503_s21 = scalar_lea.vmem [#allocation2], %s1541_s12 }
  0x2a   : > { %1099 = vmatpush3.bf16.msra.mxu0 %v1204_v2  ;;  %v695_v9 = vld [vmem:[%s529_s17] sm:$0xf]  ;;  %s1548_s15 = sshll.u32 %s786_s14, 6  ;;  %s790_s27 = sshll.u32 %s503_s21, 4  ;;  %s1568_s27 = int_to_ptr.vmem [resolvable:$true] %s790_s27 }
  0x2b   : > { %1112 = vmatprep.subr.bf16.mxu0 %v1365_v0  ;;  %1107 = vmatpush3.bf16.msra.mxu1 %v1207_v4  ;;  %v1065_v12 = vld [vmem:[%s545_s22] ss:$0 sm:$0xff]  ;;  %s553_s17 = scalar_lea.vmem %s1701_s8, %s1508_s26  ;;  %s1729_s25 = sadd.s32 4294967295, %s1363_s24  }
  0x2c   : > { %s1557_s28 = sand.u32 1, %s1729_s25   ;;  %s1716_s20 = scalar_lea.vmem [#allocation4], %s1541_s12  ;;  %v1069_v24 = vld [vmem:[%s553_s17] ss:$0 sm:$0xff] }
  0x2d   : > { %1101 = vmatmul.mubr.msk.bf16.vlgmr.msra.gmra.mrb[0].mxu0 %vm579_vm1, %v555_v5  ;;  %s805_s23 = sshll.u32 %s1716_s20, 4  ;;  %s1566_s26 = scalar_lea.hbm %s1702_s9, %s1548_s15  ;;  %s1576_s23 = int_to_ptr.vmem [resolvable:$true] %s805_s23 }
  0x2e   : > { %1113 = vmatpush3.bf16.msra.mxu0 %v1206_v6  ;;  %1116 = vmatprep.mubr.msk.bf16.mxu0 %vm1366_vm0, %v1365_v0  ;;  %s1730_s14 = sld [smem:[#allocation17_spill]]  ;;  %s765_s10 = scalar_lea.sflag [#allocation3], %s501_s19 }
  0x2f   : > { %1114 = vmatprep.subr.bf16.mxu0 %v1365_v0  ;;  %1109 = vmatmul.mubr.msk.bf16.vlgmr.msra.gmra.mrb[0].mxu1 %vm579_vm1, %v626_v7  ;;  %s1209_s25 = scalar_lea.vmem %s1568_s27, 64  ;;  %s1367_s16 = smov [#allocation2]  }
  0x30   : > { %p1210_p0 = scmp.ne.s32.totalorder %s1568_s27, %s1209_s25  ;;  %s1213_s29 = sshll.u32 %s1367_s16, 4  ;;  %s1214_s29 = int_to_ptr.vmem [resolvable:$false] %s1213_s29 }
  0x31   : > { %s1215_s20 = scalar_lea.vmem %s1214_s29, 128  ;;  %p1216_p4 = scmp.lt.s32.totalorder %s1568_s27, %s1214_s29 }
  0x32   : > { %1115 = vmatpush3.bf16.msra.mxu0 %v1208_v8  ;;  %p1211_p1 = pnand %p1210_p0, %p1483_p3  ;;  %p1217_p5 = scmp.lt.s32.totalorder %s1215_s20, %s1209_s25 }
  0x34   : > { %s1574_s11 = scalar_lea.hbm %s1730_s14, %s1548_s15  ;;  %p1212_p2 = pneg %p1211_p1 }
  0x35   : > { %1117 = vmatmul.mubr.msk.bf16.vlgmr.msra.gmra.mrb[4].mxu0 %vm579_vm1, %v695_v9  ;;  %p1218_p6 = por %p1217_p5, %p1216_p4 }
  0x37   : > { %p1219_p7 = pnand %p1218_p6, %p1212_p2 }
 0x100   : > { %v617_v11 = vpop.f32.mrb[0].mxu0 }
 0x101   : > { %v618_v13 = vadd.f32 %v1061_v10, %v617_v11  ;;  %v1102_v14 = vpop.f32.mrb[1].mxu0 }
 0x102   : > { %v620_v15 = vpop.f32.mrb[2].mxu0  ;;  %v687_v16 = vpop.f32.mrb[0].mxu1 }
 0x103   : > { %v623_v17 = vpack.c.bf16 %v618_v13, %v618_v13  ;;  %v1103_v18 = vpop.f32.mrb[3].mxu0  ;;  %v688_v19 = vadd.f32 %v1065_v12, %v687_v16  ;;  %v1110_v20 = vpop.f32.mrb[1].mxu1 }
 0x104   : > { %v690_v21 = vpop.f32.mrb[2].mxu1 }
 0x105   : > { %v693_v22 = vpack.c.bf16 %v688_v19, %v688_v19  ;;  %v1111_v23 = vpop.f32.mrb[3].mxu1  ;;  %625 = vst.msk [vmem:[%s503_s21] sm:$0xf] %vm624_vm2, %v623_v17 }
 0x106   : > { %1222 = shalt.err (!%p1219_p7)
}
 0x107   : > { %s1223_s19 = scalar_lea.hbm %s1566_s26, 64  ;;  %s1227_s13 = scalar_lea.hbm %s1702_s9, 256 }
 0x108   : > { %p1224_p9 = scmp.ne.s32.totalorder %s1566_s26, %s1223_s19  ;;  %p1228_p12 = scmp.lt.u32.totalorder %s1566_s26, %s1702_s9 }
 0x109   : > { %p1229_p13 = scmp.lt.u32.totalorder %s1227_s13, %s1223_s19  ;;  %p1231_p1 = scmp.lt.u32.totalorder %s1223_s19, %s1566_s26 }
 0x10a   : > { %p1225_p10 = pnand %p1224_p9, %p1483_p3 }
 0x10b   : > { %p1230_p0 = por %p1229_p13, %p1228_p12 }
 0x10c   : > { %p1226_p11 = pneg %p1225_p10 }
 0x10d   : > { %p1232_p2 = por %p1231_p1, %p1230_p0 }
 0x10f   : > { %p1233_p4 = pnand %p1232_p2, %p1226_p11 }
 0x111   : > { %1236 = shalt.err (!%p1233_p4)
}
 0x112   : > { %1120 = dma.vmem_to_hbm [thread:$0]  (%p1483_p3), %s1568_s27, 64, %s1566_s26, %s765_s10   ;;  %v756_v25 = vpop.f32.mrb[4].mxu0 }
 0x113   : > { %s1731_s20 = scalar_lea.vmem [#allocation4], %s1541_s12  ;;  %s517_s25 = scalar_lea.vmem [#allocation6], %s1541_s12 }
 0x114   : > { %694 = vst.msk [vmem:[%s1731_s20] sm:$0xf] %vm624_vm2, %v693_v22  ;;  %s1608_s29 = sshll.u32 %s517_s25, 4  ;;  %s770_s19 = scalar_lea.sflag [#allocation5], %s1557_s28  ;;  %s821_s29 = int_to_ptr.vmem [resolvable:$true] %s1608_s29 }
 0x115   : > { %s1237_s21 = scalar_lea.vmem %s1576_s23, 64  ;;  %s1368_s17 = smov [#allocation4]  }
 0x116   : > { %p1238_p5 = scmp.ne.s32.totalorder %s1576_s23, %s1237_s21  ;;  %s1241_s13 = sshll.u32 %s1368_s17, 4  ;;  %s1242_s13 = int_to_ptr.vmem [resolvable:$false] %s1241_s13 }
 0x117   : > { %s1243_s22 = scalar_lea.vmem %s1242_s13, 128  ;;  %p1244_p9 = scmp.lt.s32.totalorder %s1576_s23, %s1242_s13 }
 0x118   : > { %p1239_p6 = pnand %p1238_p5, %p1483_p3  ;;  %p1245_p10 = scmp.lt.s32.totalorder %s1243_s22, %s1237_s21 }
 0x11a   : > { %p1240_p7 = pneg %p1239_p6  ;;  %p1246_p11 = por %p1245_p10, %p1244_p9 }
 0x11c   : > { %p1247_p12 = pnand %p1246_p11, %p1240_p7 }
 0x11e   : > { %1250 = shalt.err (!%p1247_p12)
}
 0x11f   : > { %s1251_s27 = scalar_lea.hbm %s1574_s11, 64  ;;  %s1255_s16 = scalar_lea.hbm %s1730_s14, 256 }
 0x120   : > { %p1252_p13 = scmp.ne.s32.totalorder %s1574_s11, %s1251_s27  ;;  %p1256_p2 = scmp.lt.u32.totalorder %s1574_s11, %s1730_s14 }
 0x121   : > { %p1257_p4 = scmp.lt.u32.totalorder %s1255_s16, %s1251_s27  ;;  %p1259_p6 = scmp.lt.u32.totalorder %s1251_s27, %s1574_s11 }
 0x122   : > { %p1253_p0 = pnand %p1252_p13, %p1483_p3 }
 0x123   : > { %p1258_p5 = por %p1257_p4, %p1256_p2 }
 0x124   : > { %p1254_p1 = pneg %p1253_p0 }
 0x125   : > { %p1260_p7 = por %p1259_p6, %p1258_p5 }
 0x127   : > { %p1261_p9 = pnand %p1260_p7, %p1254_p1 }
 0x129   : > { %1264 = shalt.err (!%p1261_p9)
}
 0x12a   : > { %1121 = dma.vmem_to_hbm [thread:$0]  (%p1483_p3), %s1576_s23, 64, %s1574_s11, %s770_s19   ;;  %v757_v26 = vadd.f32 %v1069_v24, %v756_v25  ;;  %v1118_v27 = vpop.f32.mrb[5].mxu0 }
 0x12b   : > { %v759_v28 = vpop.f32.mrb[6].mxu0  ;;  %s1732_s22 = sld [smem:[#allocation18_spill]]  ;;  %s1265_s10 = scalar_lea.vmem %s821_s29, 64 }
 0x12c   : > { %v762_v29 = vpack.c.bf16 %v757_v26, %v757_v26  ;;  %v1119_v30 = vpop.f32.mrb[7].mxu0  ;;  %p1266_p10 = scmp.ne.s32.totalorder %s821_s29, %s1265_s10  ;;  %s1369_s23 = smov [#allocation6]  }
 0x12d   : > { %s1269_s11 = sshll.u32 %s1369_s23, 4  ;;  %s1270_s11 = int_to_ptr.vmem [resolvable:$false] %s1269_s11 }
 0x12e   : > { %763 = vst.msk [vmem:[%s517_s25] sm:$0xf] %vm624_vm2, %v762_v29  ;;  %p1267_p11 = pnand %p1266_p10, %p1483_p3  ;;  %s1271_s16 = scalar_lea.vmem %s1270_s11, 128 }
 0x12f   : > { %p1272_p13 = scmp.lt.s32.totalorder %s821_s29, %s1270_s11  ;;  %p1273_p0 = scmp.lt.s32.totalorder %s1271_s16, %s1265_s10 }
 0x130   : > { %p1268_p12 = pneg %p1267_p11 }
 0x131   : > { %s1733_s27 = smov %s1732_s22  ;;  %s1638_s26 = scalar_lea.hbm %s1732_s22, %s1548_s15 }
 0x132   : > { %p1274_p1 = por %p1273_p0, %p1272_p13 }
 0x134   : > { %p1275_p2 = pnand %p1274_p1, %p1268_p12 }
 0x136   : > { %1278 = shalt.err (!%p1275_p2)
}
 0x137   : > { %s1279_s12 = scalar_lea.hbm %s1638_s26, 64  ;;  %s1283_s20 = scalar_lea.hbm %s1733_s27, 256 }
 0x138   : > { %p1280_p4 = scmp.ne.s32.totalorder %s1638_s26, %s1279_s12  ;;  %p1284_p7 = scmp.lt.u32.totalorder %s1638_s26, %s1733_s27 }
 0x139   : > { %p1285_p9 = scmp.lt.u32.totalorder %s1283_s20, %s1279_s12  ;;  %p1287_p11 = scmp.lt.u32.totalorder %s1279_s12, %s1638_s26 }
 0x13a   : > { %p1281_p5 = pnand %p1280_p4, %p1483_p3 }
 0x13b   : > { %p1286_p10 = por %p1285_p9, %p1284_p7 }
 0x13c   : > { %p1282_p6 = pneg %p1281_p5 }
 0x13d   : > { %p1288_p12 = por %p1287_p11, %p1286_p10 }
 0x13f   : > { %p1289_p13 = pnand %p1288_p12, %p1282_p6 }
 0x141   : > { %1292 = shalt.err (!%p1289_p13)
}
 0x142   : > { %1122 = dma.vmem_to_hbm [thread:$0]  (%p1483_p3), %s821_s29, 64, %s1638_s26, %s770_s19  }
 0x143 PF: > { %s1734_s13 = sld [smem:[#allocation9_spill]]  ;;  %p1136_p0 = scmp.ge.s32.totalorder %s1363_s24, 2 }
 0x145   : > { %p1127_p1 = pnand %p1136_p0, %p1494_p8 }
 0x149   : > { %s832_s10 = sand.u32 1, %s1734_s13  }
 0x14a   : > { %s833_s23 = scalar_lea.sflag [#allocation3], %s832_s10 }
 0x14b   : > { %1326 = dma.done.wait (!%p1127_p1), %s833_s23, 64  }
 0x14c   : > { %1328 = vsyncadd (!%p1127_p1), %s833_s23, 4294967232  ;;  %s1736_s11 = sadd.s32 4294967294, %s1363_s24  }
 0x14d   : > { %s841_s16 = sand.u32 1, %s1736_s11  }
 0x14e   : > { %s842_s12 = scalar_lea.sflag [#allocation5], %s841_s16 }
 0x14f   : > { %1330 = dma.done.wait (!%p1127_p1), %s842_s12, 128  }
 0x150   : > { %1332 = vsyncadd (!%p1127_p1), %s842_s12, 4294967168  ;;  %s28_s24 = sadd.s32 1, %s1363_s24   ;;  %s1737_s30 = sld [smem:[#allocation10_spill]] }
 0x151   : > { %p25_p3 = scmp.ge.s32.totalorder %s28_s24, 6   ;;  %s1738_s19 = sld [smem:[#allocation16_spill]] }
 0x152   : > { %s1739_s20 = sld [smem:[#allocation11_spill]]  ;;  %s1740_s21 = sld [smem:[#allocation12_spill]] }
 0x153   : > { %s1741_s22 = sld [smem:[#allocation13_spill]]  ;;  %s1742_s23 = sld [smem:[#allocation14_spill]] }
 0x154   : > { %s1743_s17 = smov %s1339_s18  ;;  %27 = sbr.rel (!%p25_p3) target bundleno = 10 (0xa), region = 147 }
 0x156   : > { %s1744_s18 = smov %s1737_s30 }
 0x15b   :  { %856 = vsyncpa [#allocation3], 1 }
 0x15c   :  { %858 = vsyncpa [#allocation3 + $0x1], 1 }
 0x15d   :  { %859 = vsyncpa [#allocation5], 1 }
 0x15e   :  { %861 = vsyncpa [#allocation5 + $0x1], 1 }

</bundles_post_ra>
